<compile_context>
chip_gen: v5e
topology: v5e:2x2
jax: 0.10.0
libtpu: 0.0.40
codegen_flags: <defaults>
</compile_context>

<pallas_src>
import functools
import math

import jax
import jax.numpy as jnp
from jax.experimental import pallas as pl
from jax.experimental.pallas import tpu as pltpu


# ----------------------------------------------------------------------------
# Parameter setup (PyTorch __init__): deterministic sin/cos table, plain JAX.
# ----------------------------------------------------------------------------
def _build_positional_encoding(seq_length: int, d_model: int) -> jnp.ndarray:
    position = jnp.arange(0, seq_length, dtype=jnp.float32)[:, None]           # (S, 1)
    div_term = jnp.exp(
        jnp.arange(0, d_model, 2, dtype=jnp.float32) * (-math.log(10000.0) / d_model)
    )                                                                           # (D/2,)
    angles = position * div_term                                                # (S, D/2)
    pe = jnp.zeros((seq_length, d_model), dtype=jnp.float32)
    pe = pe.at[:, 0::2].set(jnp.sin(angles))
    pe = pe.at[:, 1::2].set(jnp.cos(angles))
    return pe[None, :, :]                                                       # (1, S, D)


# ----------------------------------------------------------------------------
# Kernels
# ----------------------------------------------------------------------------
def _pe_add_kernel(x_ref, pe_ref, o_ref):
    # Eval mode: dropout is the identity — just the broadcasted add.
    y = x_ref[...].astype(jnp.float32) + pe_ref[...].astype(jnp.float32)
    o_ref[...] = y.astype(o_ref.dtype)


def _pe_add_dropout_kernel(x_ref, pe_ref, bits_ref, o_ref, *, threshold: int,
                           inv_keep: float):
    # Train mode: inverted dropout. `bits` are uniform int32; keeping iff
    # bits >= threshold gives P(keep) = 1 - p exactly (no signed-shift bias).
    y = x_ref[...].astype(jnp.float32) + pe_ref[...].astype(jnp.float32)
    keep = (bits_ref[...] >= jnp.int32(threshold)).astype(jnp.float32)
    o_ref[...] = (y * (keep * jnp.float32(inv_keep))).astype(o_ref.dtype)


# ----------------------------------------------------------------------------
# Layout / tiling helpers
# ----------------------------------------------------------------------------
_TILE_VMEM_BUDGET = 20 * 1024 * 1024      # per-step resident bytes (incl. 2x buffering)
_VMEM_LIMIT_BYTES = 48 * 1024 * 1024      # safe on v5e/v6e (128 MiB) and v7x (64 MiB)


def _pick_layout(S: int, D: int):
    """Pick a lane-dense (rows, lanes) factorization of the (S, D) slab."""
    if D % 128 == 0:
        return S, D
    if (S * D) % 128 == 0:
        return (S * D) // 128, 128
    return S, D   # fallback: correct, just not lane-dense


def _pick_row_tile(R: int, L: int, per_elem_bytes: int, budget_bytes: int) -> int:
    """Largest row tile that divides R, respects the 8-row granule, fits budget."""
    max_rows = max(8, budget_bytes // max(1, per_elem_bytes * L))
    if R <= max_rows:
        return R
    t = min(int(max_rows), R - 1)
    t -= t % 8
    while t >= 8:
        if R % t == 0:
            return t
        t -= 8
    return R


# ----------------------------------------------------------------------------
# Forward wrapper
# ----------------------------------------------------------------------------
def positional_encoding_forward(x, pe_full, *, dropout_p: float, train: bool,
                                rng_key=None):
    """
    x:       (B, S, D) embeddings (f32 or bf16)
    pe_full: (1, seq_length, D) precomputed table, seq_length >= S
    rng_key: jax PRNG key for the dropout mask (required iff train and p > 0)
    """
    B, S, D = x.shape
    assert pe_full.ndim == 3 and pe_full.shape[0] == 1
    assert pe_full.shape[2] == D and pe_full.shape[1] >= S

    apply_dropout = bool(train) and float(dropout_p) > 0.0
    if apply_dropout and float(dropout_p) >= 1.0:
        return jnp.zeros_like(x)

    # Lane-dense re-layout of the per-batch (S, D) slab (free contiguous reshape).
    R, L = _pick_layout(S, D)
    x_lay = x.reshape(B, R, L)

    if L == D:
        pe_lay = pe_full                              # index only the first S rows
    elif (pe_full.shape[1] * D) % L == 0:
        pe_lay = pe_full.reshape(1, -1, L)            # no slice needed
    else:
        pe_lay = pe_full[:, :S, :].reshape(1, R, L)
    pe_lay = pe_lay.astype(x.dtype)                   # keep HBM traffic in input dtype

    # Row tile sized against a conservative VMEM budget (double-buffered pipeline).
    itemsize = jnp.dtype(x.dtype).itemsize
    per_elem = (itemsize * 3 + (4 if apply_dropout else 0)) * 2
    tR = _pick_row_tile(R, L, per_elem, _TILE_VMEM_BUDGET)

    # Block second-minor dim must be a multiple of 8 or span the full array dim:
    # if the tile is small, present the PE table with exactly R rows.
    if tR % 8 != 0 and pe_lay.shape[1] != R:
        pe_lay = pe_lay[:, :R, :]

    grid = (B, R // tR)
    blk = (1, tR, L)
    x_spec = pl.BlockSpec(blk, lambda b, r: (b, r, 0))
    pe_spec = pl.BlockSpec(blk, lambda b, r: (0, r, 0))     # broadcast over batch
    out_spec = pl.BlockSpec(blk, lambda b, r: (b, r, 0))
    out_shape = jax.ShapeDtypeStruct((B, R, L), x.dtype)
    cparams = pltpu.CompilerParams(
        dimension_semantics=("parallel", "parallel"),       # fully independent tiles
        vmem_limit_bytes=_VMEM_LIMIT_BYTES,
    )

    if apply_dropout:
        if rng_key is None:
            raise ValueError("rng_key is required when train=True and dropout_p > 0")
        raw = jax.random.bits(rng_key, (B, R, L), dtype=jnp.uint32)
        bits = jax.lax.bitcast_convert_type(raw, jnp.int32)  # uniform over int32
        # P(bits >= t) = 1 - p  for signed-int32 uniform bits.
        threshold = int(round(float(dropout_p) * (2.0 ** 32))) - 2 ** 31
        threshold = max(-(2 ** 31), min(threshold, 2 ** 31 - 1))
        kernel = functools.partial(
            _pe_add_dropout_kernel,
            threshold=threshold,
            inv_keep=1.0 / (1.0 - float(dropout_p)),
        )
        out_lay = pl.pallas_call(
            kernel,
            out_shape=out_shape,
            grid=grid,
            in_specs=[x_spec, pe_spec, pl.BlockSpec(blk, lambda b, r: (b, r, 0))],
            out_specs=out_spec,
            compiler_params=cparams,
        )(x_lay, pe_lay, bits)
    else:
        out_lay = pl.pallas_call(
            _pe_add_kernel,
            out_shape=out_shape,
            grid=grid,
            in_specs=[x_spec, pe_spec],
            out_specs=out_spec,
            compiler_params=cparams,
        )(x_lay, pe_lay)

    return out_lay.reshape(B, S, D)


# ----------------------------------------------------------------------------
# Demo / self-check
# ----------------------------------------------------------------------------
if __name__ == "__main__":
    # Small shapes consistent with the module: batch=2, seq=8, d_model=32.
    B, S, D = 2, 8, 32
    seq_length = 16            # table built for a longer max length
    dropout_p = 0.1

    key = jax.random.PRNGKey(0)
    k_x, k_drop = jax.random.split(key)
    x = jax.random.normal(k_x, (B, S, D), dtype=jnp.float32)
    pe_full = _build_positional_encoding(seq_length, D)

    # Training mode: dropout active (mask from host-generated random bits).
    out_train = positional_encoding_forward(
        x, pe_full, dropout_p=dropout_p, train=True, rng_key=k_drop)
    out_train = jax.block_until_ready(out_train)

    # Eval mode: dropout is the identity — check against a pure-JAX reference.
    out_eval = positional_encoding_forward(
        x, pe_full, dropout_p=dropout_p, train=False)
    out_eval = jax.block_until_ready(out_eval)

    ref_eval = x + pe_full[:, :S, :]
    assert out_train.shape == (B, S, D)
    assert out_eval.shape == (B, S, D)
    assert jnp.allclose(out_eval, ref_eval, atol=1e-6), "eval-mode mismatch vs reference"

    # Training-mode validity: every element is either dropped (0) or kept & scaled.
    scaled = ref_eval / (1.0 - dropout_p)
    valid = jnp.isclose(out_train, 0.0, atol=1e-6) | jnp.isclose(
        out_train, scaled, atol=1e-5, rtol=1e-5)
    assert bool(jnp.all(valid)), "train-mode outputs are not {0, (x+pe)/(1-p)}"

    print("KERNEL_OK")
</pallas_src>

<mosaic_0001>
module attributes {stable_mosaic.version = 11 : i64} {
  func.func @_pe_add_dropout_kernel(%arg0: i32, %arg1: i32, %arg2: memref<1x2x128xf32, #tpu.memory_space<vmem>>, %arg3: memref<1x2x128xf32, #tpu.memory_space<vmem>>, %arg4: memref<1x2x128xi32, #tpu.memory_space<vmem>>, %arg5: memref<1x2x128xf32, #tpu.memory_space<vmem>>) attributes {dimension_semantics = [#tpu.dimension_semantics<parallel>, #tpu.dimension_semantics<parallel>], iteration_bounds = array<i64: 2, 1>, scalar_prefetch = 0 : i64, scratch_operands = 0 : i64, tpu.core_type = #tpu.core_type<tc>, window_params = [{transform_indices = @transform_0, window_bounds = array<i64: 1, 2, 128>}, {transform_indices = @transform_1, window_bounds = array<i64: 1, 2, 128>}, {transform_indices = @transform_2, window_bounds = array<i64: 1, 2, 128>}, {transform_indices = @transform_3, window_bounds = array<i64: 1, 2, 128>}]} {
    %c0 = arith.constant 0 : index
    %c0_0 = arith.constant 0 : index
    %c0_1 = arith.constant 0 : index
    %0 = vector.load %arg2[%c0, %c0_0, %c0_1] : memref<1x2x128xf32, #tpu.memory_space<vmem>>, vector<1x2x128xf32>
    %c0_2 = arith.constant 0 : index
    %c0_3 = arith.constant 0 : index
    %c0_4 = arith.constant 0 : index
    %1 = vector.load %arg3[%c0_2, %c0_3, %c0_4] : memref<1x2x128xf32, #tpu.memory_space<vmem>>, vector<1x2x128xf32>
    %2 = arith.addf %0, %1 : vector<1x2x128xf32>
    %c0_5 = arith.constant 0 : index
    %c0_6 = arith.constant 0 : index
    %c0_7 = arith.constant 0 : index
    %3 = vector.load %arg4[%c0_5, %c0_6, %c0_7] : memref<1x2x128xi32, #tpu.memory_space<vmem>>, vector<1x2x128xi32>
    %c-1717986918_i32 = arith.constant -1717986918 : i32
    %4 = vector.broadcast %c-1717986918_i32 : i32 to vector<1x2x128xi32>
    %5 = arith.cmpi sge, %3, %4 : vector<1x2x128xi32>
    %6 = arith.extui %5 : vector<1x2x128xi1> to vector<1x2x128xi32>
    %7 = arith.sitofp %6 : vector<1x2x128xi32> to vector<1x2x128xf32>
    %cst = arith.constant 1.11111116 : f32
    %8 = vector.broadcast %cst : f32 to vector<1x2x128xf32>
    %9 = arith.mulf %7, %8 : vector<1x2x128xf32>
    %10 = arith.mulf %2, %9 : vector<1x2x128xf32>
    %c0_8 = arith.constant 0 : index
    %c0_9 = arith.constant 0 : index
    %c0_10 = arith.constant 0 : index
    %11 = vector.load %arg5[%c0_8, %c0_9, %c0_10] : memref<1x2x128xf32, #tpu.memory_space<vmem>>, vector<1x2x128xf32>
    tpu.vector_store %arg5[%c0_8, %c0_9, %c0_10], %10 {strides = array<i32>} : memref<1x2x128xf32, #tpu.memory_space<vmem>>, vector<1x2x128xf32>,
    return
  }
  func.func @transform_0(%arg0: i32, %arg1: i32) -> (i32, i32, i32) {
    %c0_i32 = arith.constant 0 : i32
    %c0_i32_0 = arith.constant 0 : i32
    return %arg0, %arg1, %c0_i32 : i32, i32, i32
  }
  func.func @transform_1(%arg0: i32, %arg1: i32) -> (i32, i32, i32) {
    %c0_i32 = arith.constant 0 : i32
    %c0_i32_0 = arith.constant 0 : i32
    %c0_i32_1 = arith.constant 0 : i32
    return %c0_i32, %arg1, %c0_i32_0 : i32, i32, i32
  }
  func.func @transform_2(%arg0: i32, %arg1: i32) -> (i32, i32, i32) {
    %c0_i32 = arith.constant 0 : i32
    %c0_i32_0 = arith.constant 0 : i32
    return %arg0, %arg1, %c0_i32 : i32, i32, i32
  }
  func.func @transform_3(%arg0: i32, %arg1: i32) -> (i32, i32, i32) {
    %c0_i32 = arith.constant 0 : i32
    %c0_i32_0 = arith.constant 0 : i32
    return %arg0, %arg1, %c0_i32 : i32, i32, i32
  }
}

</mosaic_0001>

<bundles_post_ra>
// kernel: tpu_custom_call.1
= control target key start
LH: loop header
LB: loop body
LE: loop exit
PB: predicated region body
PF: predicated region fallthrough
CT: control target
= control target key end

     0   :  { %8 = vsyncpa [#allocation3], 0  ;;  %s875_s0 = inlined_call_operand.hbm [shape: f32[2,2,128], index: 0, kind: input, shape index: {}]   ;;  %s876_s1 = inlined_call_operand.hbm [shape: f32[1,2,128], index: 1, kind: input, shape index: {}]   ;;  %s877_s2 = inlined_call_operand.hbm [shape: s32[2,2,128], index: 2, kind: input, shape index: {}]   ;;  %s878_s3 = inlined_call_operand.hbm [shape: f32[2,2,128], index: 3, kind: output, shape index: {}]  }
   0x1   :  { %10 = vsyncpa [#allocation3 + $0x1], 0 }
   0x2   :  { %11 = vsyncpa [#allocation6], 0 }
   0x3   :  { %12 = vsyncpa [#allocation4], 0 }
   0x4   :  { %14 = vsyncpa [#allocation4 + $0x1], 0  ;;  %s708_s12 = smov 0   ;;  %s710_s13 = smov 0  }
   0x5   :  { %s712_s14 = smov 0   ;;  %s714_s15 = smov 0  }
   0x6   :  { %s716_s16 = smov 0   ;;  %s718_s17 = smov 0  }
   0x7 LB: > { %s32_s18 = sadd.s32 1, %s680_s16  ;;  %s41_s19 = sadd.s32 1, %s672_s14  ;;  %s684_s17 = sphi %s718_s17, %s20_s17   ;;  %s680_s16 = sphi %s716_s16, %s889_s16   ;;  %s676_s15 = sphi %s714_s15, %s888_s15   ;;  %s672_s14 = sphi %s712_s14, %s887_s14   ;;  %s668_s13 = sphi %s710_s13, %s886_s13   ;;  %s664_s12 = sphi %s708_s12, %s885_s12  }
   0x8   : > { %p34_p0 = scmp.ge.s32.totalorder %s32_s18, 2  ;;  %p48_p1 = scmp.ne.s32.totalorder %s672_s14, %s668_s13 }
   0x9   : > { %p49_p2 = scmp.eq.s32.totalorder %s684_s17, 0  ;;  %p410_p3 = scmp.ge.s32.totalorder %s684_s17, 2 }
   0xa   : > { %s891_s18 = smov (%p34_p0, %s32_s18), 0  ;;  %p451_p5 = scmp.lt.s32.totalorder %s684_s17, 2 }
   0xb   : > { %p749_p4 = por %p49_p2, %p48_p1  ;;  %s36_s21 = ssub.s32 %s680_s16, %s891_s18 }
   0xc   : > { %s174_s22 = sand.u32 1, %s684_s17   ;;  %p39_p6 = scmp.eq.s32.totalorder %s36_s21, 0 }
   0xd   : > { %s176_s23 = sand.u32 1, %s672_s14   ;;  %s412_s24 = sshll.u32 %s680_s16, 1 }
   0xe   : > { %s760_s25 = scalar_select %p39_p6, %s672_s14, %s41_s19  }
   0xf   : > { %s762_s26 = sshll.u32 %s176_s23, 1  ;;  %s183_s29 = scalar_lea.hbm %s875_s0, %s412_s24 }
  0x10   : > { %s185_s30 = sshll.u32 %s183_s29, 4  ;;  %s178_s4 = scalar_lea.vmem [#allocation2], %s762_s26  ;;  %s186_s30 = int_to_ptr.hbm [resolvable:$true] %s185_s30 }
  0x11   : > { %s187_s5 = sshll.u32 %s178_s4, 4  ;;  %p772_p7 = pnand %p451_p5, %p749_p4  ;;  %s188_s5 = int_to_ptr.vmem [resolvable:$true] %s187_s5 }
  0x12   : > { %s203_s9 = scalar_lea.hbm %s877_s2, %s412_s24  ;;  %s175_s10 = scalar_lea.sflag [#allocation3], %s174_s22 }
  0x13   : > { %442 = dma.hbm_to_vmem [thread:$0]  (!%p772_p7), %s186_s30, 32, %s188_s5, %s175_s10  }
  0x14   : > { %s782_s11 = sadd.s32 4294967295, %s684_s17   ;;  %s407_s19 = sadd.s32 4294967294, %s684_s17  }
  0x15   : > { %p54_p8 = scmp.ne.s32.totalorder %s668_s13, %s664_s12  ;;  %p55_p9 = scmp.eq.s32.totalorder %s782_s11, 0 }
  0x16   : > { %p134_p10 = scmp.eq.s32.totalorder %s782_s11, 1  ;;  %p140_p11 = scmp.eq.s32.totalorder %s407_s19, 1 }
  0x17   : > { %p408_p12 = scmp.ge.s32.totalorder %s684_s17, 1  ;;  %p792_p13 = por %p55_p9, %p54_p8 }
  0x18   : > { %p799_p0 = por %p134_p10, %p48_p1  ;;  %p803_p2 = por %p140_p11, %p54_p8 }
  0x19   : > { %p147_p4 = scmp.lt.s32.totalorder %s684_s17, 3  ;;  %s161_s28 = sshll.u32 %s876_s1, 4  ;;  %s162_s28 = int_to_ptr.hbm [resolvable:$true] %s161_s28 }
  0x1a   : > { %s205_s29 = sshll.u32 %s203_s9, 4  ;;  %s686_s30 = smov [#allocation5]   ;;  %s206_s29 = int_to_ptr.hbm [resolvable:$true] %s205_s29 }
  0x1b   : > { %p808_p5 = pnand %p408_p12, %p147_p4  ;;  %s163_s4 = sshll.u32 %s686_s30, 4  ;;  %s164_s4 = int_to_ptr.vmem [resolvable:$true] %s163_s4 }
  0x1c   : > { %s198_s5 = scalar_lea.vmem [#allocation7], %s762_s26  ;;  %s218_s8 = sand.u32 (!%p808_p5), 1, %s782_s11  }
  0x1d   : > { %p435_p1 = pneg %p808_p5  ;;  %s207_s7 = sshll.u32 %s198_s5, 4  ;;  %s208_s7 = int_to_ptr.vmem [resolvable:$true] %s207_s7 }
  0x1e   : > { %445 = dma.hbm_to_vmem [thread:$0]  (!%p772_p7), %s206_s29, 32, %s208_s7, %s175_s10  }
  0x1f   : > { %p436_p6 = pnand %p435_p1, %p55_p9  ;;  %216 = sbr.rel (%p808_p5) target bundleno = 56 (0x38), region = 32 }
  0x20   : > { %s220_s9 = sand.u32 (!%p808_p5), 1, %s668_s13   ;;  %s219_s24 = scalar_lea.sflag (!%p808_p5), [#allocation3], %s218_s8 }
  0x21   : > { %438 = dma.hbm_to_vmem [thread:$0]  (!%p436_p6), %s162_s28, 32, %s164_s4, [#allocation6]  }
  0x22   : > { %s416_s19 = sshll.u32 (!%p808_p5), %s220_s9, 1 }
  0x23   : > { %s222_s27 = scalar_lea.vmem (!%p808_p5), [#allocation2], %s416_s19 }
  0x24   : > { %647 = dma.done.wait (%p792_p13), %s219_s24, 32  }
  0x25   : > { %649 = vsyncadd (%p792_p13), %s219_s24, 4294967264 }
  0x26   : > { %651 = dma.done.wait (%p55_p9), [#allocation6], 32  }
  0x27   : > { %653 = vsyncadd (%p55_p9), [#allocation6], 4294967264  ;;  %s237_s26 = scalar_lea.vmem [#allocation7], %s416_s19 }
  0x28   : > { %655 = dma.done.wait (%p792_p13), %s219_s24, 32  }
  0x29   : > { %657 = vsyncadd (%p792_p13), %s219_s24, 4294967264  ;;  %s422_s6 = sshll.u32 %s676_s15, 1  ;;  %v266_v0 = vld [vmem:[%s222_s27] sm:$0x3]  ;;  %v267_v1 = vld [vmem:[#allocation5] sm:$0x3] }
  0x2a   : > { %s288_s28 = scalar_lea.hbm %s878_s3, %s422_s6  ;;  %v269_v2 = vld [vmem:[%s237_s26] sm:$0x3]  ;;  %v268_v3 = vadd.f32 %v267_v1, %v266_v0  ;;  %v687_v4 = vmov 0.0   ;;  %s265_s11 = scalar_lea.vmem [#allocation8], %s416_s19 }
  0x2b   : > { %vm270_vm0 = vcmp.ge.s32.totalorder %v269_v2, 2576980378  ;;  %s290_s29 = sshll.u32 %s265_s11, 4  ;;  %s292_s30 = sshll.u32 %s288_s28, 4  ;;  %s291_s29 = int_to_ptr.vmem [resolvable:$true] %s290_s29  ;;  %s293_s30 = int_to_ptr.hbm [resolvable:$true] %s292_s30 }
  0x2c   : > { %v420_v5 = vsel %vm270_vm0, 1.0, %v687_v4  ;;  %s277_s15 = scalar_lea.sflag [#allocation4], %s220_s9  ;;  %s608_s20 = sshra.s32 %s293_s30, 4  ;;  %s609_s20 = int_to_ptr.hbm [resolvable:$true] %s608_s20 }
  0x2d   : > { %v273_v6 = vmul.f32 1.1111112, %v420_v5  ;;  %s610_s4 = scalar_lea.hbm %s609_s20, 2  ;;  %s614_s8 = scalar_lea.hbm %s878_s3, 4 }
  0x2e   : > { %p611_p7 = scmp.ne.s32.totalorder %s609_s20, %s610_s4  ;;  %p615_p10 = scmp.lt.s32.totalorder %s609_s20, %s878_s3 }
  0x2f   : > { %v274_v7 = vmul.f32 %v273_v6, %v268_v3  ;;  %p616_p11 = scmp.lt.s32.totalorder %s614_s8, %s610_s4 }
  0x30   : > { %p612_p8 = pnand %p611_p7, %p799_p0 }
  0x31   : > { %275 = vst [vmem:[%s265_s11] sm:$0x3] %v274_v7  ;;  %p617_p12 = por %p616_p11, %p615_p10 }
  0x32   : > { %p613_p9 = pneg %p612_p8 }
  0x34   : > { %p618_p13 = pnand %p617_p12, %p613_p9 }
  0x36   : > { %621 = shalt.err (!%p618_p13)
}
  0x37   : > { %433 = dma.vmem_to_hbm [thread:$0]  (%p799_p0), %s291_s29, 32, %s293_s30, %s277_s15  }
  0x38 PF: > { %s304_s9 = sand.u32 1, %s664_s12   ;;  %p447_p4 = pnand %p410_p3, %p803_p2 }
  0x39   : > { %s305_s27 = scalar_lea.sflag [#allocation4], %s304_s9 }
  0x3a   : > { %p448_p5 = pneg %p447_p4 }
  0x3c   : > { %659 = dma.done.wait (%p448_p5), %s305_s27, 32  }
  0x3d   : > { %661 = vsyncadd (%p448_p5), %s305_s27, 4294967264  ;;  %s20_s17 = sadd.s32 1, %s684_s17   ;;  %s885_s12 = smov %s668_s13 }
  0x3e   : > { %p17_p1 = scmp.ge.s32.totalorder %s20_s17, 4   ;;  %s886_s13 = smov %s672_s14 }
  0x3f   : > { %s887_s14 = smov %s760_s25  ;;  %s888_s15 = smov %s680_s16 }
  0x40   : > { %s889_s16 = smov %s891_s18  ;;  %19 = sbr.rel (!%p17_p1) target bundleno = 7 (0x7), region = 93 }
  0x45   :  { %311 = vsyncpa [#allocation3], 1 }
  0x46   :  { %313 = vsyncpa [#allocation3 + $0x1], 1 }
  0x47   :  { %314 = vsyncpa [#allocation6], 1 }
  0x48   :  { %315 = vsyncpa [#allocation4], 1 }
  0x49   :  { %317 = vsyncpa [#allocation4 + $0x1], 1 }

</bundles_post_ra>
